<compile_context>
chip_gen: v7x
topology: tpu7x:2x2x1
jax: 0.10.0
libtpu: 0.0.40
codegen_flags: <defaults>
</compile_context>

<pallas_src>
import functools

import jax
import jax.numpy as jnp
from jax.experimental import pallas as pl
from jax.experimental.pallas import tpu as pltpu

PHOS_DIM = 165   # fixed by the module (targets[:, :165])


def _round_up(x, m):
    return (x + m - 1) // m * m


def _default_num_chunks():
    """2 chunks (one per TensorCore) on v7x, 1 on single-TC v5e/v6e."""
    try:
        kind = jax.devices()[0].device_kind.lower()
    except Exception:
        return 1
    return 2 if "v7" in kind else 1


def _phosc_loss_kernel(phos_ref, phoc_ref, tgt_ref, out_ref,
                       acc_phos_ref, acc_phoc_ref, *,
                       phos_w, phoc_w, batch, block_rows, steps,
                       phos_dim, phoc_dim, binary_phoc):
    c = pl.program_id(0)   # chunk (parallel axis; one per TensorCore on v7x)
    i = pl.program_id(1)   # batch-tile step within the chunk (reduction axis)

    @pl.when(i == 0)
    def _init():
        acc_phos_ref[...] = jnp.zeros_like(acc_phos_ref)
        acc_phoc_ref[...] = jnp.zeros_like(acc_phoc_ref)

    # row_start uses the *unclamped* tile index so clamped (duplicated) tiles
    # of the last chunk always take the masked path and contribute zero.
    row_start = (c * steps + i) * block_rows

    # ---- PHOS branch: squared error --------------------------------------
    phos_pred = phos_ref[...].astype(jnp.float32)
    phos_tgt = tgt_ref[:, :phos_dim].astype(jnp.float32)
    diff = phos_pred - phos_tgt
    sq = diff * diff

    # ---- PHOC branch: binary cross entropy (probabilities in) -------------
    phoc_pred = phoc_ref[...].astype(jnp.float32)
    phoc_tgt = tgt_ref[:, phos_dim:].astype(jnp.float32)
    if binary_phoc:
        # Exact for strictly-binary targets: one log per element (EUP saver).
        q = jnp.where(phoc_tgt > 0.5, phoc_pred, 1.0 - phoc_pred)
        bce = -jnp.maximum(jnp.log(q), -100.0)
    else:
        # General path; torch BCE clamps each log term at -100.
        log_p = jnp.maximum(jnp.log(phoc_pred), -100.0)
        log_1mp = jnp.maximum(jnp.log(1.0 - phoc_pred), -100.0)
        bce = -(log_1mp + phoc_tgt * (log_p - log_1mp))

    is_full = row_start + block_rows <= batch

    @pl.when(is_full)
    def _fast():
        # Interior tiles: no mask, row-sum into lane-shaped VMEM accumulators.
        acc_phos_ref[...] += jnp.sum(sq, axis=0, keepdims=True)
        acc_phoc_ref[...] += jnp.sum(bce, axis=0, keepdims=True)

    @pl.when(jnp.logical_not(is_full))
    def _slow():
        # Ragged last tile / fully out-of-range clamped tiles: mask rows.
        row_ids = (jax.lax.broadcasted_iota(jnp.int32, (block_rows, 1), 0)
                   + row_start)
        valid = row_ids < batch
        acc_phos_ref[...] += jnp.sum(jnp.where(valid, sq, 0.0),
                                     axis=0, keepdims=True)
        acc_phoc_ref[...] += jnp.sum(jnp.where(valid, bce, 0.0),
                                     axis=0, keepdims=True)

    # ---- finalize this chunk's (already weighted) contribution ------------
    @pl.when(i == pl.num_programs(1) - 1)
    def _fin():
        inv_n_phos = 1.0 / (batch * phos_dim)
        inv_n_phoc = 1.0 / (batch * phoc_dim)
        out_ref[0, 0] = (phos_w * jnp.sum(acc_phos_ref[...]) * inv_n_phos
                         + phoc_w * jnp.sum(acc_phoc_ref[...]) * inv_n_phoc)


def phosc_loss(y_phos, y_phoc, targets, phos_w=4.5, phoc_w=1.0,
               block_rows=1024, num_chunks=None, assume_binary_phoc=False):
    """Pallas implementation of PHOSCLoss.forward. Returns a scalar."""
    B, pd = y_phos.shape
    assert pd == PHOS_DIM
    phoc_dim = y_phoc.shape[1]
    assert targets.shape == (B, PHOS_DIM + phoc_dim)

    if num_chunks is None:
        num_chunks = _default_num_chunks()

    # Sublane multiple depends on dtype: f32 -> 8, bf16 -> 16, int8/fp8 -> 32.
    def _sub(dt):
        return max(8, 32 // jnp.dtype(dt).itemsize)

    sub = max(_sub(y_phos.dtype), _sub(y_phoc.dtype), _sub(targets.dtype))
    tb = max(sub, min(block_rows, _round_up(B, sub)))
    tb = _round_up(tb, sub)

    n_tiles = pl.cdiv(B, tb)
    chunks = max(1, min(int(num_chunks), n_tiles))
    steps = pl.cdiv(n_tiles, chunks)

    def in_map(c, i):
        # Clamp so over-provisioned (c, i) pairs of the last chunk stay in
        # bounds; their rows are masked out inside the kernel.
        t = jnp.minimum(c * steps + i, n_tiles - 1)
        return (t, 0)

    kernel = functools.partial(
        _phosc_loss_kernel,
        phos_w=float(phos_w), phoc_w=float(phoc_w),
        batch=B, block_rows=tb, steps=steps,
        phos_dim=PHOS_DIM, phoc_dim=phoc_dim,
        binary_phoc=bool(assume_binary_phoc))

    nbytes = (y_phos.size * y_phos.dtype.itemsize
              + y_phoc.size * y_phoc.dtype.itemsize
              + targets.size * targets.dtype.itemsize
              + chunks * 4)
    cost = pl.CostEstimate(
        flops=8 * (y_phos.size + y_phoc.size),
        transcendentals=(1 if assume_binary_phoc else 2) * y_phoc.size,
        bytes_accessed=nbytes)

    partial = pl.pallas_call(
        kernel,
        out_shape=jax.ShapeDtypeStruct((chunks, 1), jnp.float32),
        grid=(chunks, steps),
        in_specs=[
            pl.BlockSpec((tb, PHOS_DIM), in_map),
            pl.BlockSpec((tb, phoc_dim), in_map),
            # Full targets row is DMA'd; the unaligned 165-split happens on
            # the VMEM-resident tile (no HBM relayout copy in the wrapper).
            pl.BlockSpec((tb, PHOS_DIM + phoc_dim), in_map),
        ],
        out_specs=pl.BlockSpec((1, 1), lambda c, i: (c, 0),
                               memory_space=pltpu.SMEM),
        scratch_shapes=[pltpu.VMEM((1, PHOS_DIM), jnp.float32),
                        pltpu.VMEM((1, phoc_dim), jnp.float32)],
        compiler_params=pltpu.CompilerParams(
            dimension_semantics=("parallel", "arbitrary"),
            vmem_limit_bytes=32 * 1024 * 1024),
        cost_estimate=cost,
    )(y_phos, y_phoc, targets)

    # Per-chunk contributions are already weighted/normalized -> just sum.
    return jnp.sum(partial)


def _phosc_loss_ref(y_phos, y_phoc, targets, phos_w=4.5, phoc_w=1.0):
    """Pure-JAX reference for correctness checking."""
    phos_tgt = targets[:, :PHOS_DIM]
    phoc_tgt = targets[:, PHOS_DIM:]
    mse = jnp.mean((y_phos.astype(jnp.float32)
                    - phos_tgt.astype(jnp.float32)) ** 2)
    p = y_phoc.astype(jnp.float32)
    t = phoc_tgt.astype(jnp.float32)
    log_p = jnp.maximum(jnp.log(p), -100.0)
    log_1mp = jnp.maximum(jnp.log(1.0 - p), -100.0)
    bce = jnp.mean(-(t * log_p + (1.0 - t) * log_1mp))
    return phos_w * mse + phoc_w * bce


def _make_inputs(key, batch, phoc_dim):
    k1, k2, k3, k4 = jax.random.split(key, 4)
    # Model outputs: PHOS is an unconstrained regression output, PHOC is a
    # probability (the real model ends with a sigmoid).
    y_phos = jax.random.normal(k1, (batch, PHOS_DIM), dtype=jnp.float32)
    y_phoc = jax.nn.sigmoid(
        jax.random.normal(k2, (batch, phoc_dim), dtype=jnp.float32))
    t_phos = jax.random.normal(k3, (batch, PHOS_DIM), dtype=jnp.float32)
    t_phoc = (jax.random.uniform(k4, (batch, phoc_dim)) > 0.5).astype(jnp.float32)
    targets = jnp.concatenate([t_phos, t_phoc], axis=1)
    return y_phos, y_phoc, targets


if __name__ == "__main__":
    key = jax.random.PRNGKey(0)
    k_small, k_big = jax.random.split(key, 2)

    # --- small sanity case: batch=2, synthetic PHOC width 64 ---------------
    y_phos, y_phoc, targets = _make_inputs(k_small, batch=2, phoc_dim=64)
    loss = phosc_loss(y_phos, y_phoc, targets)
    loss = jax.block_until_ready(loss)
    ref = _phosc_loss_ref(y_phos, y_phoc, targets)
    assert jnp.allclose(loss, ref, rtol=1e-5, atol=1e-5), (loss, ref)

    # --- ragged multi-tile / multi-chunk case: real PHOC width 604 ---------
    y_phos2, y_phoc2, targets2 = _make_inputs(k_big, batch=20, phoc_dim=604)
    loss2 = phosc_loss(y_phos2, y_phoc2, targets2,
                       block_rows=8, num_chunks=2)
    loss2 = jax.block_until_ready(loss2)
    ref2 = _phosc_loss_ref(y_phos2, y_phoc2, targets2)
    assert jnp.allclose(loss2, ref2, rtol=1e-5, atol=1e-4), (loss2, ref2)

    # --- binary-target single-log BCE fast path (exact for {0,1} targets) --
    loss3 = phosc_loss(y_phos2, y_phoc2, targets2, assume_binary_phoc=True)
    loss3 = jax.block_until_ready(loss3)
    assert jnp.allclose(loss3, ref2, rtol=1e-5, atol=1e-4), (loss3, ref2)

    # --- bf16 inputs (half HBM bytes); kernel upcasts in VMEM --------------
    y_phos_bf = y_phos2.astype(jnp.bfloat16)
    y_phoc_bf = y_phoc2.astype(jnp.bfloat16)
    targets_bf = targets2.astype(jnp.bfloat16)
    loss4 = phosc_loss(y_phos_bf, y_phoc_bf, targets_bf)
    loss4 = jax.block_until_ready(loss4)
    ref4 = _phosc_loss_ref(y_phos_bf, y_phoc_bf, targets_bf)
    assert jnp.allclose(loss4, ref4, rtol=1e-4, atol=1e-4), (loss4, ref4)

    print("KERNEL_OK")
</pallas_src>

<mosaic_0001>
module attributes {stable_mosaic.version = 11 : i64} {
  func.func @_phosc_loss_kernel(%arg0: i32, %arg1: i32, %arg2: memref<8x165xf32, #tpu.memory_space<vmem>>, %arg3: memref<8x64xf32, #tpu.memory_space<vmem>>, %arg4: memref<8x229xf32, #tpu.memory_space<vmem>>, %arg5: memref<1x1xf32, #tpu.memory_space<smem>>, %arg6: memref<1x165xf32, #tpu.memory_space<vmem>>, %arg7: memref<1x64xf32, #tpu.memory_space<vmem>>) attributes {dimension_semantics = [#tpu.dimension_semantics<parallel>, #tpu.dimension_semantics<arbitrary>], iteration_bounds = array<i64: 1, 1>, scalar_prefetch = 0 : i64, scratch_operands = 2 : i64, tpu.core_type = #tpu.core_type<tc>, window_params = [{transform_indices = @transform_0, window_bounds = array<i64: 8, 165>}, {transform_indices = @transform_1, window_bounds = array<i64: 8, 64>}, {transform_indices = @transform_2, window_bounds = array<i64: 8, 229>}, {transform_indices = @transform_3, window_bounds = array<i64: 1, 1>}]} {
    %c0_i32 = arith.constant 0 : i32
    %0 = arith.cmpi eq, %arg1, %c0_i32 : i32
    %1 = arith.extui %0 : i1 to i32
    %c0_i32_0 = arith.constant 0 : i32
    %2 = arith.cmpi ne, %1, %c0_i32_0 : i32
    scf.if %2 {
      %cst_15 = arith.constant 0.000000e+00 : f32
      %35 = vector.broadcast %cst_15 : f32 to vector<1x165xf32>
      %c0_16 = arith.constant 0 : index
      %c0_17 = arith.constant 0 : index
      %36 = vector.load %arg6[%c0_16, %c0_17] : memref<1x165xf32, #tpu.memory_space<vmem>>, vector<1x165xf32>
      tpu.vector_store %arg6[%c0_16, %c0_17], %35 {strides = array<i32>} : memref<1x165xf32, #tpu.memory_space<vmem>>, vector<1x165xf32>,
      %cst_18 = arith.constant 0.000000e+00 : f32
      %37 = vector.broadcast %cst_18 : f32 to vector<1x64xf32>
      %c0_19 = arith.constant 0 : index
      %c0_20 = arith.constant 0 : index
      %38 = vector.load %arg7[%c0_19, %c0_20] : memref<1x64xf32, #tpu.memory_space<vmem>>, vector<1x64xf32>
      tpu.vector_store %arg7[%c0_19, %c0_20], %37 {strides = array<i32>} : memref<1x64xf32, #tpu.memory_space<vmem>>, vector<1x64xf32>,
    } else {
    }
    %c1_i32 = arith.constant 1 : i32
    %3 = arith.muli %arg0, %c1_i32 : i32
    %4 = arith.addi %3, %arg1 : i32
    %c8_i32 = arith.constant 8 : i32
    %5 = arith.muli %4, %c8_i32 : i32
    %c0 = arith.constant 0 : index
    %c0_1 = arith.constant 0 : index
    %6 = vector.load %arg2[%c0, %c0_1] : memref<8x165xf32, #tpu.memory_space<vmem>>, vector<8x165xf32>
    %c0_2 = arith.constant 0 : index
    %c0_3 = arith.constant 0 : index
    %7 = vector.load %arg4[%c0_2, %c0_3] : memref<8x229xf32, #tpu.memory_space<vmem>>, vector<8x165xf32>
    %8 = arith.subf %6, %7 : vector<8x165xf32>
    %9 = arith.mulf %8, %8 : vector<8x165xf32>
    %c0_4 = arith.constant 0 : index
    %c0_5 = arith.constant 0 : index
    %10 = vector.load %arg3[%c0_4, %c0_5] : memref<8x64xf32, #tpu.memory_space<vmem>>, vector<8x64xf32>
    %c0_6 = arith.constant 0 : index
    %c165 = arith.constant 165 : index
    %11 = vector.load %arg4[%c0_6, %c165] : memref<8x229xf32, #tpu.memory_space<vmem>>, vector<8x64xf32>
    %12 = math.log %10 : vector<8x64xf32>
    %cst = arith.constant -1.000000e+02 : f32
    %13 = vector.broadcast %cst : f32 to vector<8x64xf32>
    %14 = arith.maximumf %12, %13 : vector<8x64xf32>
    %cst_7 = arith.constant 1.000000e+00 : f32
    %15 = vector.broadcast %cst_7 : f32 to vector<8x64xf32>
    %16 = arith.subf %15, %10 : vector<8x64xf32>
    %17 = math.log %16 : vector<8x64xf32>
    %cst_8 = arith.constant -1.000000e+02 : f32
    %18 = vector.broadcast %cst_8 : f32 to vector<8x64xf32>
    %19 = arith.maximumf %17, %18 : vector<8x64xf32>
    %20 = arith.subf %14, %19 : vector<8x64xf32>
    %21 = arith.mulf %11, %20 : vector<8x64xf32>
    %22 = arith.addf %19, %21 : vector<8x64xf32>
    %cst_9 = arith.constant 0.000000e+00 : f32
    %23 = vector.broadcast %cst_9 : f32 to vector<8x64xf32>
    %24 = arith.subf %23, %22 : vector<8x64xf32>
    %c8_i32_10 = arith.constant 8 : i32
    %25 = arith.addi %5, %c8_i32_10 : i32
    %c2_i32 = arith.constant 2 : i32
    %26 = arith.cmpi sle, %25, %c2_i32 : i32
    %27 = arith.extui %26 : i1 to i32
    %c0_i32_11 = arith.constant 0 : i32
    %28 = arith.cmpi ne, %27, %c0_i32_11 : i32
    scf.if %28 {
      %c0_15 = arith.constant 0 : index
      %c0_16 = arith.constant 0 : index
      %35 = vector.load %arg6[%c0_15, %c0_16] : memref<1x165xf32, #tpu.memory_space<vmem>>, vector<1x165xf32>
      %cst_17 = arith.constant dense<0.000000e+00> : vector<165xf32>
      %36 = vector.multi_reduction <add>, %9, %cst_17 [0] : vector<8x165xf32> to vector<165xf32>
      %37 = vector.shape_cast %36 : vector<165xf32> to vector<1x165xf32>
      %38 = arith.addf %35, %37 : vector<1x165xf32>
      %c0_18 = arith.constant 0 : index
      %c0_19 = arith.constant 0 : index
      %39 = vector.load %arg6[%c0_18, %c0_19] : memref<1x165xf32, #tpu.memory_space<vmem>>, vector<1x165xf32>
      tpu.vector_store %arg6[%c0_18, %c0_19], %38 {strides = array<i32>} : memref<1x165xf32, #tpu.memory_space<vmem>>, vector<1x165xf32>,
      %c0_20 = arith.constant 0 : index
      %c0_21 = arith.constant 0 : index
      %40 = vector.load %arg7[%c0_20, %c0_21] : memref<1x64xf32, #tpu.memory_space<vmem>>, vector<1x64xf32>
      %cst_22 = arith.constant dense<0.000000e+00> : vector<64xf32>
      %41 = vector.multi_reduction <add>, %24, %cst_22 [0] : vector<8x64xf32> to vector<64xf32>
      %42 = vector.shape_cast %41 : vector<64xf32> to vector<1x64xf32>
      %43 = arith.addf %40, %42 : vector<1x64xf32>
      %c0_23 = arith.constant 0 : index
      %c0_24 = arith.constant 0 : index
      %44 = vector.load %arg7[%c0_23, %c0_24] : memref<1x64xf32, #tpu.memory_space<vmem>>, vector<1x64xf32>
      tpu.vector_store %arg7[%c0_23, %c0_24], %43 {strides = array<i32>} : memref<1x64xf32, #tpu.memory_space<vmem>>, vector<1x64xf32>,
    } else {
    }
    %true = arith.constant true
    %29 = arith.xori %26, %true : i1
    %30 = arith.extui %29 : i1 to i32
    %c0_i32_12 = arith.constant 0 : i32
    %31 = arith.cmpi ne, %30, %c0_i32_12 : i32
    scf.if %31 {
      %35 = tpu.iota {dimensions = array<i32: 0>} : vector<8x1xi32>
      %36 = vector.broadcast %5 : i32 to vector<8x1xi32>
      %37 = arith.addi %35, %36 : vector<8x1xi32>
      %c2_i32_15 = arith.constant 2 : i32
      %38 = vector.broadcast %c2_i32_15 : i32 to vector<8x1xi32>
      %39 = arith.cmpi slt, %37, %38 : vector<8x1xi32>
      %c0_16 = arith.constant 0 : index
      %c0_17 = arith.constant 0 : index
      %40 = vector.load %arg6[%c0_16, %c0_17] : memref<1x165xf32, #tpu.memory_space<vmem>>, vector<1x165xf32>
      %cst_18 = arith.constant 0.000000e+00 : f32
      %41 = vector.shape_cast %39 : vector<8x1xi1> to vector<8x1xi1>
      %42 = vector.broadcast %41 : vector<8x1xi1> to vector<8x165xi1>
      %43 = vector.broadcast %cst_18 : f32 to vector<8x165xf32>
      %44 = arith.select %42, %9, %43 : vector<8x165xi1>, vector<8x165xf32>
      %cst_19 = arith.constant dense<0.000000e+00> : vector<165xf32>
      %45 = vector.multi_reduction <add>, %44, %cst_19 [0] : vector<8x165xf32> to vector<165xf32>
      %46 = vector.shape_cast %45 : vector<165xf32> to vector<1x165xf32>
      %47 = arith.addf %40, %46 : vector<1x165xf32>
      %c0_20 = arith.constant 0 : index
      %c0_21 = arith.constant 0 : index
      %48 = vector.load %arg6[%c0_20, %c0_21] : memref<1x165xf32, #tpu.memory_space<vmem>>, vector<1x165xf32>
      tpu.vector_store %arg6[%c0_20, %c0_21], %47 {strides = array<i32>} : memref<1x165xf32, #tpu.memory_space<vmem>>, vector<1x165xf32>,
      %c0_22 = arith.constant 0 : index
      %c0_23 = arith.constant 0 : index
      %49 = vector.load %arg7[%c0_22, %c0_23] : memref<1x64xf32, #tpu.memory_space<vmem>>, vector<1x64xf32>
      %cst_24 = arith.constant 0.000000e+00 : f32
      %50 = vector.shape_cast %39 : vector<8x1xi1> to vector<8x1xi1>
      %51 = vector.broadcast %50 : vector<8x1xi1> to vector<8x64xi1>
      %52 = vector.broadcast %cst_24 : f32 to vector<8x64xf32>
      %53 = arith.select %51, %24, %52 : vector<8x64xi1>, vector<8x64xf32>
      %cst_25 = arith.constant dense<0.000000e+00> : vector<64xf32>
      %54 = vector.multi_reduction <add>, %53, %cst_25 [0] : vector<8x64xf32> to vector<64xf32>
      %55 = vector.shape_cast %54 : vector<64xf32> to vector<1x64xf32>
      %56 = arith.addf %49, %55 : vector<1x64xf32>
      %c0_26 = arith.constant 0 : index
      %c0_27 = arith.constant 0 : index
      %57 = vector.load %arg7[%c0_26, %c0_27] : memref<1x64xf32, #tpu.memory_space<vmem>>, vector<1x64xf32>
      tpu.vector_store %arg7[%c0_26, %c0_27], %56 {strides = array<i32>} : memref<1x64xf32, #tpu.memory_space<vmem>>, vector<1x64xf32>,
    } else {
    }
    %c0_i32_13 = arith.constant 0 : i32
    %32 = arith.cmpi eq, %arg1, %c0_i32_13 : i32
    %33 = arith.extui %32 : i1 to i32
    %c0_i32_14 = arith.constant 0 : i32
    %34 = arith.cmpi ne, %33, %c0_i32_14 : i32
    scf.if %34 {
      %c0_15 = arith.constant 0 : index
      %c0_16 = arith.constant 0 : index
      %35 = vector.load %arg6[%c0_15, %c0_16] : memref<1x165xf32, #tpu.memory_space<vmem>>, vector<1x165xf32>
      %36 = vector.shape_cast %35 : vector<1x165xf32> to vector<1x1x165xf32>
      %cst_17 = arith.constant dense<0.000000e+00> : vector<1xf32>
      %37 = vector.multi_reduction <add>, %36, %cst_17 [1, 2] : vector<1x1x165xf32> to vector<1xf32>
      %38 = vector.shape_cast %37 : vector<1xf32> to vector<1x1x1xf32>
      %39 = vector.extract %38[0, 0, 0] : f32 from vector<1x1x1xf32>
      %cst_18 = arith.constant 4.500000e+00 : f32
      %40 = arith.mulf %cst_18, %39 : f32
      %cst_19 = arith.constant 0.00303030293 : f32
      %41 = arith.mulf %40, %cst_19 : f32
      %c0_20 = arith.constant 0 : index
      %c0_21 = arith.constant 0 : index
      %42 = vector.load %arg7[%c0_20, %c0_21] : memref<1x64xf32, #tpu.memory_space<vmem>>, vector<1x64xf32>
      %43 = vector.shape_cast %42 : vector<1x64xf32> to vector<1x1x64xf32>
      %cst_22 = arith.constant dense<0.000000e+00> : vector<1xf32>
      %44 = vector.multi_reduction <add>, %43, %cst_22 [1, 2] : vector<1x1x64xf32> to vector<1xf32>
      %45 = vector.shape_cast %44 : vector<1xf32> to vector<1x1x1xf32>
      %46 = vector.extract %45[0, 0, 0] : f32 from vector<1x1x1xf32>
      %cst_23 = arith.constant 1.000000e+00 : f32
      %47 = arith.mulf %cst_23, %46 : f32
      %cst_24 = arith.constant 7.812500e-03 : f32
      %48 = arith.mulf %47, %cst_24 : f32
      %49 = arith.addf %41, %48 : f32
      %c0_25 = arith.constant 0 : index
      %c0_26 = arith.constant 0 : index
      %50 = memref.load %arg5[%c0_25, %c0_26] : memref<1x1xf32, #tpu.memory_space<smem>>
      memref.store %49, %arg5[%c0_25, %c0_26] : memref<1x1xf32, #tpu.memory_space<smem>>
    } else {
    }
    return
  }
  func.func @transform_0(%arg0: i32, %arg1: i32) -> (i32, i32) {
    %c1_i32 = arith.constant 1 : i32
    %0 = arith.muli %arg0, %c1_i32 : i32
    %1 = arith.addi %0, %arg1 : i32
    %c0_i32 = arith.constant 0 : i32
    %2 = arith.minsi %1, %c0_i32 : i32
    %c0_i32_0 = arith.constant 0 : i32
    %c0_i32_1 = arith.constant 0 : i32
    return %2, %c0_i32_0 : i32, i32
  }
  func.func @transform_1(%arg0: i32, %arg1: i32) -> (i32, i32) {
    %c1_i32 = arith.constant 1 : i32
    %0 = arith.muli %arg0, %c1_i32 : i32
    %1 = arith.addi %0, %arg1 : i32
    %c0_i32 = arith.constant 0 : i32
    %2 = arith.minsi %1, %c0_i32 : i32
    %c0_i32_0 = arith.constant 0 : i32
    %c0_i32_1 = arith.constant 0 : i32
    return %2, %c0_i32_0 : i32, i32
  }
  func.func @transform_2(%arg0: i32, %arg1: i32) -> (i32, i32) {
    %c1_i32 = arith.constant 1 : i32
    %0 = arith.muli %arg0, %c1_i32 : i32
    %1 = arith.addi %0, %arg1 : i32
    %c0_i32 = arith.constant 0 : i32
    %2 = arith.minsi %1, %c0_i32 : i32
    %c0_i32_0 = arith.constant 0 : i32
    %c0_i32_1 = arith.constant 0 : i32
    return %2, %c0_i32_0 : i32, i32
  }
  func.func @transform_3(%arg0: i32, %arg1: i32) -> (i32, i32) {
    %c0_i32 = arith.constant 0 : i32
    %c0_i32_0 = arith.constant 0 : i32
    return %arg0, %c0_i32 : i32, i32
  }
}

</mosaic_0001>

<bundles_post_ra>
// kernel: tpu_custom_call.1
= control target key start
LH: loop header
LB: loop body
LE: loop exit
PB: predicated region body
PF: predicated region fallthrough
CT: control target
= control target key end

     0   :  { %8 = vsyncpa [#allocation5], 0  ;;  %s660_s0 = inlined_call_operand.hbm [shape: f32[2,165], index: 0, kind: input, shape index: {}]   ;;  %s661_s1 = inlined_call_operand.vmem [shape: f32[2,64], index: 1, kind: input, shape index: {}]   ;;  %s662_s2 = inlined_call_operand.vmem [shape: f32[2,229], index: 2, kind: input, shape index: {}]   ;;  %s663_s3 = inlined_call_operand.hbm [shape: f32[1,1], index: 3, kind: output, shape index: {}]  }
   0x1   :  { %9 = vsyncpa [#allocation6], 0 }
   0x2   :  { %21 = vsyncadd [#allocation5], 192  ;;  %s539_s12 = smov [#allocation4]   ;;  %s503_s16 = scalar_lea.hbm %s660_s0, 64 }
   0x3   :  { %s27_s13 = sshll.u32 %s539_s12, 4  ;;  %p504_p0 = scmp.ne.s32.totalorder %s660_s0, %s503_s16  ;;  %s28_s13 = int_to_ptr.vmem [resolvable:$true] %s27_s13 }
   0x4   :  { %p507_p1 = scmp.lt.u32.totalorder %s503_s16, %s660_s0 }
   0x6   :  { %p509_p2 = pnand %p507_p1, %p504_p0 }
   0x8   :  { %512 = shalt.err (!%p509_p2)
}
   0x9   :  { %s513_s21 = scalar_lea.vmem %s28_s13, 64  ;;  %s517_s22 = scalar_lea.vmem %s28_s13, 256 }
   0xa   :  { %p514_p3 = scmp.ne.s32.totalorder %s28_s13, %s513_s21  ;;  %p518_p4 = scmp.lt.s32.totalorder %s28_s13, %s28_s13 }
   0xb   :  { %p519_p5 = scmp.lt.s32.totalorder %s517_s22, %s513_s21 }
   0xd   :  { %p520_p6 = por %p519_p5, %p518_p4 }
   0xf   :  { %p521_p7 = pnand %p520_p6, %p514_p3 }
  0x11   :  { %524 = shalt.err (!%p521_p7)
}
  0x12   :  { %s540_s23 = smov 64   ;;  %s541_s24 = smov 4  }
  0x13   :  { %33 = dma.hbm_to_vmem [thread:$0]  %s660_s0, 64, %s28_s13, [#allocation5], %s540_s23, %s540_s23, %s541_s24  }
  0x14   :  { %535 = dma.done.wait [#allocation5], 256  }
  0x15   :  { %536 = vsyncadd [#allocation5], 4294967040  ;;  %v169_v0 = vld [vmem:[%s661_s1] sm:$0xff]  ;;  %v144_v2 = vlaneseq  ;;  %v542_v3 = vmov 1983009808   ;;  %s543_s0 = smov 37  }
  0x16   :  { %499 = vlog2.f32 %v169_v0  ;;  %v177_v1 = vsub.f32 1.0, %v169_v0  ;;  %v185_v4 = vunpack.c.l.s4 %v542_v3  ;;  %v544_v21 = vmov 0.0   ;;  %v153_v22 = vld [vmem:[#allocation4] sm:$0xf]  ;;  %v154_v23 = vld [vmem:[#allocation4 + $0x4] sm:$0xf] }
  0x17   :  { %v583_v8 = vshrl.u32 %v144_v2, 7  ;;  %vm595_vm0 = vcmp.lt.s32.totalorder %v144_v2, 165  ;;  %v155_v24 = vld [vmem:[#allocation4 + $0x8] sm:$0xf]  ;;  %v156_v25 = vld [vmem:[#allocation4 + $0xc] sm:$0xf] }
  0x18   :  { %501 = vlog2.f32 %v177_v1  ;;  %v186_v7 = vunpack.c.0.s8 %v185_v4  ;;  %148 = vst.msk [vmem:[#allocation2] sm:$0x3] %vm595_vm0, %v544_v21  ;;  %v157_v26 = vld [vmem:[%s662_s2] sm:$0xf]  ;;  %v158_v27 = vld [vmem:[%s662_s2 + $0x4] sm:$0xf] }
  0x19   :  { %v159_v28 = vld [vmem:[%s662_s2 + $0x8] sm:$0xf]  ;;  %v160_v29 = vld [vmem:[%s662_s2 + $0xc] sm:$0xf]  ;;  %v161_v30 = vsub.f32 %v153_v22, %v157_v26  ;;  %v162_v31 = vsub.f32 %v154_v23, %v158_v27  ;;  %vm330_vm1 = vcmp.lt.s32.totalorder %v583_v8, 2  ;;  %vm366_vm2 = vcmask 302080  }
  0x1a   :  { %v589_v13 = vsub.s32 %v186_v7, %v583_v8  ;;  %v163_v32 = vsub.f32 %v155_v24, %v159_v28  ;;  %v164_v33 = vsub.f32 %v156_v25, %v160_v29  ;;  %v545_v50 = vmov 1966171168   ;;  %v170_v62 = vld [vmem:[%s662_s2 + $0x2] sm:$0x3]  ;;  %v171_v0 = vld [vmem:[%s662_s2 + $0x6] sm:$0x3] }
  0x1b   :  { %v165_v34 = vmul.f32 %v161_v30, %v161_v30  ;;  %v166_v35 = vmul.f32 %v162_v31, %v162_v31  ;;  %v378_v51 = vunpack.c.l.s4 %v545_v50  ;;  %v172_v3 = vld [vmem:[%s662_s2 + $0xa] sm:$0x3]  ;;  %vm149_vm3 = vcmask 516096   ;;  %s525_s25 = scalar_lea.hbm %s663_s3, 16 }
  0x1c   :  { %v167_v36 = vmul.f32 %v163_v32, %v163_v32  ;;  %v168_v37 = vmul.f32 %v164_v33, %v164_v33  ;;  %150 = vst.msk [vmem:[#allocation3] sm:$0x1] %vm149_vm3, %v544_v21  ;;  %v418_v27 = vsub.s32 0, %v583_v8  ;;  %v422_v28 = vsub.s32 1, %v583_v8  ;;  %p526_p8 = scmp.ne.s32.totalorder %s663_s3, %s525_s25  ;;  %p529_p9 = scmp.lt.u32.totalorder %s525_s25, %s663_s3 }
  0x1d   :  { %v338_v38 = vcombine.low %v165_v34, %v166_v35  ;;  %v379_v56 = vunpack.c.0.s8 %v378_v51  ;;  %vm426_vm4 = vcmask 1040384   ;;  %vm428_vm5 = vcmask 294912  }
  0x1e   :  { %v339_v39 = vcombine.low %v167_v36, %v168_v37  ;;  %vm400_vm6 = vcmask 523264   ;;  %p531_p10 = pnand %p529_p9, %p526_p8 }
  0x1f   :  { %v346_v40 = vrot.slane %v338_v38, %v589_v13  ;;  %v382_v1 = vsub.s32 %v379_v56, %v583_v8 }
  0x20   :  { %v500_v5 = vpop.eup %499  ;;  %v353_v41 = vrot.slane %v339_v39, %v589_v13 }
  0x21   :  { %v175_v6 = vmul.f32 0.6931472, %v500_v5  ;;  %v173_v5 = vld [vmem:[%s662_s2 + $0xe] sm:$0x3]  ;;  %s546_s2 = smov 91  }
  0x22   :  { %v502_v9 = vpop.eup %501  ;;  %v354_v42 = vcombine.low %v346_v40, %v353_v41  ;;  %v355_v43 = vcombine.high %v346_v40, %v353_v41 }
  0x23   :  { %v176_v10 = vmax.f32 %v175_v6, -100.0  ;;  %v585_v11 = vmul.f32 0.6931472, %v502_v9 }
  0x24   :  { %v358_v44 = vsel %vm330_vm1, %v354_v42, 0.0  ;;  %v359_v45 = vsel %vm330_vm1, %v355_v43, 0.0  ;;  %v398_v42 = vld [vmem:[#allocation3] sm:$0x1] }
  0x25   :  { %v180_v12 = vmax.f32 %v585_v11, -100.0  ;;  %v360_v46 = vrot.slane %v358_v44, 4  ;;  %v367_v47 = vsel %vm366_vm2, %v359_v45, 0.0 }
  0x26   :  { %v368_v48 = vrot.slane %v367_v47, 4 }
  0x27   :  { %v181_v14 = vsub.f32 %v176_v10, %v180_v12  ;;  %v361_v49 = vadd.f32 %v360_v46, %v358_v44 }
  0x28   :  { %v369_v52 = vadd.f32 %v368_v48, %v367_v47 }
  0x29   :  { %v190_v15 = vrot.slane %v181_v14, %v589_v13  ;;  %v183_v16 = vcombine.high %v181_v14, %v181_v14  ;;  %v362_v53 = vrot.slane %v361_v49, 2 }
  0x2a   :  { %v370_v54 = vrot.slane %v369_v52, 2 }
  0x2b   :  { %200 = vrot.lane.b32.xlu0 %v190_v15, %s543_s0  ;;  %v198_v17 = vcombine.high %v190_v15, %v190_v15  ;;  %v197_v18 = vrot.slane %v183_v16, %v589_v13  ;;  %v363_v55 = vadd.f32 %v362_v53, %v361_v49 }
  0x2c   :  { %v371_v57 = vadd.f32 %v370_v54, %v369_v52 }
  0x2d   :  { %204 = vrot.lane.b32.xlu1 %v197_v18, %s543_s0  ;;  %v199_v20 = vcombine.high %v197_v18, %v197_v18  ;;  %v364_v58 = vrot.slane %v363_v55, 1  ;;  %v331_v18 = vld [vmem:[#allocation2] sm:$0x3] }
  0x2e   :  { %v372_v60 = vrot.slane %v371_v57, 1 }
  0x2f   :  { %202 = vrot.lane.b32.xlu0 %v198_v17, %s543_s0  ;;  %v365_v61 = vadd.f32 %v364_v58, %v363_v55 }
  0x30   :  { %v373_v2 = vadd.f32 %v372_v60, %v371_v57 }
  0x31   :  { %206 = vrot.lane.b32.xlu1 %v199_v20, %s543_s0 }
  0x32   :  { %v376_v6 = vcombine.low %v365_v61, %v373_v2 }
  0x34   :  { %v383_v14 = vrot.slane %v376_v6, %v382_v1 }
  0x36   :  { %v390_v20 = vrot.slane %v383_v14, %v382_v1 }
  0x38   :  { %v392_v23 = vadd.f32 %v390_v20, %v331_v18 }
  0x3a   :  { %397 = vst.msk [vmem:[#allocation2] sm:$0x3] %vm595_vm0, %v392_v23 }
  0x41   :  { %v414_v29 = vld [vmem:[#allocation2] sm:$0x3] }
  0x42   :  { %v419_v30 = vrot.slane %v414_v29, %v418_v27  ;;  %v423_v31 = vrot.slane %v414_v29, %v422_v28 }
  0x44   :  { %v429_v32 = vsel %vm428_vm5, %v423_v31, 0.0 }
  0x9d   :  { %v201_v59 = vpop.permute.xlu0 %200 }
  0x9e   :  { %v212_v7 = vmul.f32 %v201_v59, %v170_v62 }
  0x9f   :  { %v205_v63 = vpop.permute.xlu1 %204 }
  0xa0   :  { %v214_v15 = vmul.f32 %v205_v63, %v172_v3 }
  0xa1   :  { %v203_v4 = vpop.permute.xlu0 %202 }
  0xa2   :  { %v213_v9 = vmul.f32 %v203_v4, %v171_v0 }
  0xa3   :  { %v207_v10 = vpop.permute.xlu1 %206 }
  0xa4   :  { %v220_v16 = vcombine.low %v212_v7, %v213_v9  ;;  %v215_v17 = vmul.f32 %v207_v10, %v173_v5 }
  0xa6   :  { %v221_v22 = vcombine.low %v214_v15, %v215_v17  ;;  %v228_v24 = vrot.slane %v220_v16, %v589_v13 }
  0xa8   :  { %v235_v25 = vrot.slane %v221_v22, %v589_v13  ;;  %v427_v13 = vsel %vm426_vm4, %v419_v30, 0.0 }
  0xa9   :  { %v430_v33 = vadd.f32 %v429_v32, %v427_v13 }
  0xaa   :  { %v236_v26 = vcombine.low %v228_v24, %v235_v25 }
  0xab   :  { %431 = vadd.xlane.f32.xlu1 %v430_v33 }
  0xac   :  { %237 = vrot.lane.b32.xlu0 %v236_v26, %s546_s2 }
 0x11e   :  { %v238_v19 = vpop.permute.xlu0 %237 }
 0x11f   :  { %v240_v21 = vadd.f32 %v238_v19, %v180_v12 }
 0x121   :  { %v241_v34 = vsub.f32 0.0, %v240_v21 }
 0x123   :  { %v399_v35 = vsel %vm330_vm1, %v241_v34, 0.0 }
 0x124   :  { %v401_v36 = vsel %vm400_vm6, %v399_v35, 0.0 }
 0x125   :  { %v402_v37 = vrot.slane %v401_v36, 4 }
 0x127   :  { %v403_v38 = vadd.f32 %v402_v37, %v401_v36 }
 0x129   :  { %v404_v39 = vrot.slane %v403_v38, 2 }
 0x12b   :  { %v405_v40 = vadd.f32 %v404_v39, %v403_v38 }
 0x12d   :  { %v406_v41 = vrot.slane %v405_v40, 1 }
 0x12f   :  { %v407_v43 = vadd.f32 %v406_v41, %v405_v40 }
 0x131   :  { %v408_v44 = vadd.f32 %v407_v43, %v398_v42 }
 0x133   :  { %410 = vst.msk [vmem:[#allocation3] sm:$0x1] %vm149_vm3, %v408_v44 }
 0x138   :  { %v432_v12 = vpop.xlane.xlu1 %431 }
 0x139   :  { %v433_v46 = vrot.slane %v432_v12, 4 }
 0x13a   :  { %v442_v45 = vld [vmem:[#allocation3] sm:$0x1] }
 0x13b   :  { %v444_v11 = vsel %vm149_vm3, %v442_v45, 0.0  ;;  %v434_v47 = vadd.f32 %v433_v46, %v432_v12 }
 0x13c   :  { %445 = vadd.xlane.f32.xlu0 %v444_v11 }
 0x13d   :  { %v435_v8 = vrot.slane %v434_v47, 2 }
 0x13f   :  { %v436_v48 = vadd.f32 %v435_v8, %v434_v47 }
 0x141   :  { %v437_v49 = vrot.slane %v436_v48, 1 }
 0x143   :  { %v438_v50 = vadd.f32 %v437_v49, %v436_v48 }
 0x145   :  { %486 = vpush %v438_v50 }
 0x176   :  { %s487_s17 = spop %486 }
 0x177   :  { %s440_s18 = smul.f32 4.5, %s487_s17 }
 0x179   :  { %s441_s19 = smul.f32 0.003030303, %s440_s18 }
 0x1c9   :  { %v446_v51 = vpop.xlane.xlu0 %445 }
 0x1ca   :  { %v447_v52 = vrot.slane %v446_v51, 4 }
 0x1cc   :  { %v448_v53 = vadd.f32 %v447_v52, %v446_v51 }
 0x1ce   :  { %v449_v54 = vrot.slane %v448_v53, 2 }
 0x1d0   :  { %v450_v55 = vadd.f32 %v449_v54, %v448_v53 }
 0x1d2   :  { %v451_v56 = vrot.slane %v450_v55, 1 }
 0x1d4   :  { %v452_v57 = vadd.f32 %v451_v56, %v450_v55 }
 0x1d6   :  { %488 = vpush %v452_v57 }
 0x207   :  { %s489_s20 = spop %488 }
 0x208   :  { %s454_s21 = smul.f32 0.0078125, %s489_s20 }
 0x20a   :  { %s455_s22 = sadd.f32 %s454_s21, %s441_s19 }
 0x20c   :  { %457 = sst [smem:[#allocation7]] %s455_s22 }
 0x20d   :  { %534 = shalt.err (!%p531_p10)
}
 0x20e   :  { %s547_s1 = smov [#allocation7]  }
 0x20f   :  { %465 = dma.smem_to_hbm %s547_s1, 16, %s663_s3, [#allocation6]  }
 0x210   :  { %537 = dma.done.wait [#allocation6], 16  }
 0x211   :  { %538 = vsyncadd [#allocation6], 4294967280 }
 0x212   :  { %469 = sfence }
 0x213   :  { %470 = vsyncpa [#allocation5], 1 }
 0x214   :  { %471 = vsyncpa [#allocation6], 1 }

</bundles_post_ra>
